<compile_context>
chip_gen: v6e
topology: v6e:2x2x1
jax: 0.10.0
libtpu: 0.0.40
codegen_flags: <defaults>
</compile_context>

<pallas_src>
import functools

import jax
import jax.numpy as jnp
from jax.experimental import pallas as pl
from jax.experimental.pallas import tpu as pltpu


def _layernorm_kernel(scale_ref, x_ref, o_ref, *, eps):
    # scale_ref: (1,) in SMEM (scalar prefetch);  x_ref/o_ref: (TM, D) in VMEM.
    x = x_ref[...].astype(jnp.float32)
    d = x.shape[-1]
    mean = jnp.mean(x, axis=-1, keepdims=True)
    diff = x - mean
    # torch std uses Bessel's correction (divide by N-1); two-pass form.
    var = jnp.sum(diff * diff, axis=-1, keepdims=True) * (1.0 / (d - 1))
    std = jnp.sqrt(var)
    # Exact reciprocal on the (TM,1) column; one broadcast multiply per element.
    inv = pl.reciprocal(std + eps)
    o_ref[...] = (diff * (scale_ref[0] * inv)).astype(o_ref.dtype)


def _choose_block_rows(m, d, itemsize):
    """Adaptive row-tile size (multiple of the sublane packing for the dtype)."""
    row_align = 8 if itemsize >= 4 else (16 if itemsize == 2 else 32)

    # Target ~2 MiB per x block (amortizes the ~0.35us/step overhead; measured
    # mem-bound kernels hit ~85% of HBM roofline at 0.5-2 MiB blocks).
    target_block_bytes = 2 << 20
    # Total pipeline VMEM budget: x + out double-buffered in the input dtype
    # plus ~3 full-tile f32 temporaries (upcast, diff, y).  <=20 MiB keeps
    # double-buffering intact on v7x (64 MiB physical / 32 MiB default scope).
    vmem_budget_bytes = 20 << 20
    per_row_bytes = d * (4 * itemsize + 3 * 4)

    tm = target_block_bytes // max(1, d * itemsize)
    tm = min(tm, vmem_budget_bytes // max(1, per_row_bytes))
    tm = max(row_align, (tm // row_align) * row_align)

    if m <= tm:
        if m >= 2 * row_align:
            # Split into >=2 tiles so the "parallel" axis can actually shard
            # across v7x's two TensorCores.
            half = -(-m // 2)
            tm = -(-half // row_align) * row_align
        else:
            tm = m  # tiny M: single full-extent block (allowed by Pallas).
    return tm


def layer_normalization(x, alpha, bias, *, eps=1e-5):
    """x: (..., D).  alpha, bias: scalar parameters, shape (1,) or ()."""
    orig_shape = x.shape
    d = orig_shape[-1]
    m = 1
    for s in orig_shape[:-1]:
        m *= s
    x2d = x.reshape(m, d)
    itemsize = jnp.dtype(x.dtype).itemsize

    # Forward only uses alpha * bias -> fold into one SMEM scalar.
    scale = (jnp.asarray(alpha, jnp.float32) * jnp.asarray(bias, jnp.float32)
             ).reshape(1)

    tm = _choose_block_rows(m, d, itemsize)
    grid = (pl.cdiv(m, tm),)

    cost = pl.CostEstimate(
        flops=10 * m * d,
        transcendentals=m,                       # sqrt / reciprocal per row
        bytes_accessed=2 * m * d * itemsize,     # pure HBM streaming
    )

    out = pl.pallas_call(
        functools.partial(_layernorm_kernel, eps=float(eps)),
        out_shape=jax.ShapeDtypeStruct((m, d), x.dtype),
        grid_spec=pltpu.PrefetchScalarGridSpec(
            num_scalar_prefetch=1,               # `scale` lands in SMEM
            grid=grid,
            in_specs=[
                pl.BlockSpec((tm, d), lambda i, scale_ref: (i, 0)),
            ],
            out_specs=pl.BlockSpec((tm, d), lambda i, scale_ref: (i, 0)),
        ),
        compiler_params=pltpu.CompilerParams(
            dimension_semantics=("parallel",),
            vmem_limit_bytes=32 * 1024 * 1024,   # raise v5e's 16 MiB default
        ),
        cost_estimate=cost,
    )(scale, x2d)

    return out.reshape(orig_shape)


if __name__ == "__main__":
    key = jax.random.PRNGKey(0)
    kx, ka, kb = jax.random.split(key, 3)

    # Small transformer-ish shapes; last dim 128 keeps stores lane-dense.
    batch, seq, d_model = 2, 8, 128
    eps = 1e-5

    x = jax.random.normal(kx, (batch, seq, d_model), jnp.float32)
    # Module default init is alpha=ones(1), bias=zeros(1); use non-trivial
    # values here so the numerical check is meaningful.
    alpha = jax.random.normal(ka, (1,), jnp.float32)
    bias = jax.random.normal(kb, (1,), jnp.float32)

    y = layer_normalization(x, alpha, bias, eps=eps)
    y = jax.block_until_ready(y)

    # Pure-JAX reference matching the PyTorch forward (unbiased std, *bias).
    mean = x.mean(axis=-1, keepdims=True)
    std = jnp.std(x, axis=-1, keepdims=True, ddof=1)
    y_ref = alpha * (x - mean) / (std + eps) * bias

    assert jnp.allclose(y, y_ref, atol=1e-5, rtol=1e-5), "mismatch vs reference"
    print("KERNEL_OK")
</pallas_src>

<mosaic_0001>
module attributes {stable_mosaic.version = 11 : i64} {
  func.func @_layernorm_kernel(%arg0: i32, %arg1: memref<1xf32, #tpu.memory_space<smem>>, %arg2: memref<8x128xf32, #tpu.memory_space<vmem>>, %arg3: memref<8x128xf32, #tpu.memory_space<vmem>>) attributes {dimension_semantics = [#tpu.dimension_semantics<parallel>], iteration_bounds = array<i64: 2>, scalar_prefetch = 1 : i64, scratch_operands = 0 : i64, tpu.core_type = #tpu.core_type<tc>, window_params = [{transform_indices = @transform_0, window_bounds = array<i64: 8, 128>}, {transform_indices = @transform_1, window_bounds = array<i64: 8, 128>}]} {
    %c0 = arith.constant 0 : index
    %c0_0 = arith.constant 0 : index
    %0 = vector.load %arg2[%c0, %c0_0] : memref<8x128xf32, #tpu.memory_space<vmem>>, vector<8x128xf32>
    %cst = arith.constant dense<0.000000e+00> : vector<8xf32>
    %1 = vector.multi_reduction <add>, %0, %cst [1] : vector<8x128xf32> to vector<8xf32>
    %2 = vector.shape_cast %1 : vector<8xf32> to vector<8x1xf32>
    %cst_1 = arith.constant 1.280000e+02 : f32
    %3 = vector.broadcast %cst_1 : f32 to vector<8x1xf32>
    %4 = arith.divf %2, %3 : vector<8x1xf32>
    %5 = vector.broadcast %4 : vector<8x1xf32> to vector<8x128xf32>
    %6 = arith.subf %0, %5 : vector<8x128xf32>
    %7 = arith.mulf %6, %6 : vector<8x128xf32>
    %cst_2 = arith.constant dense<0.000000e+00> : vector<8xf32>
    %8 = vector.multi_reduction <add>, %7, %cst_2 [1] : vector<8x128xf32> to vector<8xf32>
    %9 = vector.shape_cast %8 : vector<8xf32> to vector<8x1xf32>
    %cst_3 = arith.constant 0.00787401571 : f32
    %10 = vector.broadcast %cst_3 : f32 to vector<8x1xf32>
    %11 = arith.mulf %9, %10 : vector<8x1xf32>
    %12 = math.sqrt %11 : vector<8x1xf32>
    %cst_4 = arith.constant 9.99999974E-6 : f32
    %13 = vector.broadcast %cst_4 : f32 to vector<8x1xf32>
    %14 = arith.addf %12, %13 : vector<8x1xf32>
    %15 = tpu.reciprocal %14 : vector<8x1xf32> -> vector<8x1xf32>
    %c0_5 = arith.constant 0 : index
    %16 = memref.load %arg1[%c0_5] : memref<1xf32, #tpu.memory_space<smem>>
    %17 = vector.broadcast %16 : f32 to vector<8x1xf32>
    %18 = arith.mulf %17, %15 : vector<8x1xf32>
    %19 = vector.broadcast %18 : vector<8x1xf32> to vector<8x128xf32>
    %20 = arith.mulf %6, %19 : vector<8x128xf32>
    %c0_6 = arith.constant 0 : index
    %c0_7 = arith.constant 0 : index
    %21 = vector.load %arg3[%c0_6, %c0_7] : memref<8x128xf32, #tpu.memory_space<vmem>>, vector<8x128xf32>
    tpu.vector_store %arg3[%c0_6, %c0_7], %20 {strides = array<i32>} : memref<8x128xf32, #tpu.memory_space<vmem>>, vector<8x128xf32>,
    return
  }
  func.func @transform_0(%arg0: i32, %arg1: memref<1xf32, #tpu.memory_space<smem>>) -> (i32, i32) {
    %c0_i32 = arith.constant 0 : i32
    %c0_i32_0 = arith.constant 0 : i32
    return %arg0, %c0_i32 : i32, i32
  }
  func.func @transform_1(%arg0: i32, %arg1: memref<1xf32, #tpu.memory_space<smem>>) -> (i32, i32) {
    %c0_i32 = arith.constant 0 : i32
    %c0_i32_0 = arith.constant 0 : i32
    return %arg0, %c0_i32 : i32, i32
  }
}

</mosaic_0001>

<bundles_post_ra>
// kernel: tpu_custom_call.1
= control target key start
LH: loop header
LB: loop body
LE: loop exit
PB: predicated region body
PF: predicated region fallthrough
CT: control target
= control target key end

     0   :  { %s559_s0 = inlined_call_operand.<no memory space> [shape: f32[1], index: 0, kind: input, shape index: {}]   ;;  %s560_s1 = inlined_call_operand.hbm [shape: f32[16,128], index: 1, kind: input, shape index: {}]   ;;  %s561_s2 = inlined_call_operand.hbm [shape: f32[16,128], index: 2, kind: output, shape index: {}]  }
   0x1   :  { %7 = sst [smem:[#allocation3]] %s559_s0 }
   0x2   :  { %8 = vsyncpa [#allocation5], 0 }
   0x3   :  { %10 = vsyncpa [#allocation5 + $0x1], 0 }
   0x4   :  { %11 = vsyncpa [#allocation6], 0 }
   0x5   :  { %13 = vsyncpa [#allocation6 + $0x1], 0  ;;  %s418_s11 = smov 0   ;;  %s420_s12 = smov 0  }
   0x6   :  { %s422_s13 = smov 0   ;;  %s424_s14 = smov 0  }
   0x7 LB: > { %s439_s0 = sadd.s32 4294967295, %s396_s14   ;;  %s242_s15 = sadd.s32 4294967294, %s396_s14   ;;  %s396_s14 = sphi %s424_s14, %s578_s14   ;;  %s392_s13 = sphi %s422_s13, %s577_s13   ;;  %s388_s12 = sphi %s420_s12, %s576_s12   ;;  %s384_s11 = sphi %s418_s11, %s575_s11  }
   0x8   : > { %s443_s16 = sadd.s32 1, %s396_s14   ;;  %s26_s17 = sadd.s32 1, %s392_s13 }
   0x9   : > { %s23_s18 = ssub.s32 %s396_s14, %s443_s16  ;;  %p33_p0 = scmp.ne.s32.totalorder %s392_s13, %s388_s12 }
   0xa   : > { %p24_p1 = scmp.eq.s32.totalorder %s23_s18, 0  ;;  %p34_p2 = scmp.eq.s32.totalorder %s396_s14, 0 }
   0xb   : > { %p39_p3 = scmp.ne.s32.totalorder %s388_s12, %s384_s11  ;;  %p40_p4 = scmp.eq.s32.totalorder %s439_s0, 0 }
   0xc   : > { %s455_s19 = scalar_select %p24_p1, %s392_s13, %s26_s17  }
   0xd   : > { %p457_p5 = por %p34_p2, %p33_p0  ;;  %p461_p6 = por %p40_p4, %p39_p3 }
   0xe   : > { %p63_p7 = scmp.eq.s32.totalorder %s439_s0, 1  ;;  %p69_p8 = scmp.eq.s32.totalorder %s242_s15, 1 }
   0xf   : > { %s565_s21 = scalar_select %p461_p6, 1, 0 }
  0x10   : > { %p266_p10 = scmp.lt.s32.totalorder %s396_s14, 2  ;;  %p468_p11 = por %p63_p7, %p33_p0 }
  0x11   : > { %p472_p12 = por %p69_p8, %p39_p3  ;;  %s89_s24 = sand.u32 1, %s392_s13  }
  0x12   : > { %s566_s22 = scalar_select %p468_p11, 1, 0 }
  0x13   : > { %s567_s23 = scalar_select %p472_p12, 1, 0 }
  0x14   : > { %s246_s25 = sshll.u32 %s396_s14, 7  ;;  %s245_s26 = sshll.u32 %s89_s24, 3 }
  0x15   : > { %s481_s29 = scalar_lea.hbm %s560_s1, %s246_s25  ;;  %s93_s30 = scalar_lea.vmem [#allocation4], %s245_s26 }
  0x16   : > { %s100_s3 = sshll.u32 %s93_s30, 4  ;;  %p485_p13 = pnand %p266_p10, %p457_p5  ;;  %s489_s3 = int_to_ptr.vmem [resolvable:$true] %s100_s3 }
  0x17   : > { %s90_s5 = scalar_lea.sflag [#allocation5], %s89_s24  ;;  %s304_s6 = scalar_lea.hbm %s481_s29, 128 }
  0x18   : > { %p305_p2 = scmp.ne.s32.totalorder %s481_s29, %s304_s6  ;;  %p306_p3 = pneg %p485_p13 }
  0x19   : > { %s309_s9 = scalar_lea.hbm %s560_s1, 256  ;;  %p310_p5 = scmp.lt.s32.totalorder %s481_s29, %s560_s1 }
  0x1a   : > { %p307_p4 = pnand %p306_p3, %p305_p2  ;;  %p311_p8 = scmp.lt.s32.totalorder %s309_s9, %s304_s6 }
  0x1c   : > { %p308_p7 = pneg %p307_p4  ;;  %p312_p10 = por %p311_p8, %p310_p5 }
  0x1e   : > { %p313_p9 = pnand %p312_p10, %p308_p7 }
  0x20   : > { %316 = shalt.err (!%p313_p9)
}
  0x21   : > { %s317_s17 = scalar_lea.vmem %s489_s3, 128  ;;  %s398_s18 = smov [#allocation4]  }
  0x22   : > { %p318_p0 = scmp.ne.s32.totalorder %s489_s3, %s317_s17  ;;  %s322_s20 = sshll.u32 %s398_s18, 4  ;;  %s323_s20 = int_to_ptr.vmem [resolvable:$false] %s322_s20 }
  0x23   : > { %s324_s24 = scalar_lea.vmem %s323_s20, 256  ;;  %p325_p4 = scmp.lt.s32.totalorder %s489_s3, %s323_s20 }
  0x24   : > { %p320_p1 = pnand %p318_p0, %p306_p3  ;;  %p326_p12 = scmp.lt.s32.totalorder %s324_s24, %s317_s17 }
  0x26   : > { %p321_p2 = pneg %p320_p1  ;;  %p327_p11 = por %p326_p12, %p325_p4 }
  0x28   : > { %p328_p6 = pnand %p327_p11, %p321_p2 }
  0x2a   : > { %331 = shalt.err (!%p328_p6)
}
  0x2b   : > { %261 = dma.hbm_to_vmem [thread:$0]  (!%p485_p13), %s481_s29, 128, %s489_s3, %s90_s5  }
  0x2c   : > { %p569_p9 = scmp.lt.s32.totalorder %s396_s14, 3  ;;  %p570_p7 = scmp.ge.s32.totalorder %s396_s14, 1 }
  0x2e   : > { %p106_p0 = pnand %p570_p7, %p569_p9 }
  0x2f   : > { %s516_s25 = sand.u32 (!%p106_p0), 1, %s388_s12   ;;  %p571_p6 = scmp.ne.s32.totalorder (!%p106_p0), %s565_s21, 0 }
  0x30   : > { %109 = sbr.rel (%p106_p0) target bundleno = 390 (0x186), region = 24  ;;  %s248_s26 = sshll.u32 (!%p106_p0), %s516_s25, 3 }
  0x31   : > { %s112_s27 = scalar_lea.sflag (!%p106_p0), [#allocation5], %s516_s25  ;;  %s115_s28 = scalar_lea.vmem (!%p106_p0), [#allocation4], %s248_s26 }
  0x35   : > { %375 = dma.done.wait (%p571_p6), %s112_s27, 128  }
  0x36   : > { %377 = vsyncadd (%p571_p6), %s112_s27, 4294967168  ;;  %v134_v0 = vld [vmem:[%s115_s28] sm:$0xff]  ;;  %s153_s21 = sld [smem:[#allocation3]]  ;;  %s251_s29 = sshll.u32 %s439_s0, 7 }
  0x37   : > { %135 = vadd.xlane.f32.xlu0 %v134_v0  ;;  %s133_s30 = scalar_lea.vmem [#allocation7], %s248_s26  ;;  %s170_s6 = scalar_lea.hbm %s561_s2, %s251_s29 }
  0x38   : > { %s172_s3 = sshll.u32 %s133_s30, 4  ;;  %s159_s7 = scalar_lea.sflag [#allocation6], %s516_s25  ;;  %s173_s3 = int_to_ptr.vmem [resolvable:$true] %s172_s3 }
  0x39   : > { %s332_s8 = scalar_lea.vmem %s173_s3, 128  ;;  %p572_p12 = scmp.ne.s32.totalorder %s566_s22, 0 }
  0x3a   : > { %p333_p11 = scmp.ne.s32.totalorder %s173_s3, %s332_s8  ;;  %s399_s9 = smov [#allocation7]  }
  0x3b   : > { %s336_s10 = sshll.u32 %s399_s9, 4  ;;  %s337_s10 = int_to_ptr.vmem [resolvable:$false] %s336_s10 }
  0x3c   : > { %v154_v13 = vstv %s153_s21  ;;  %p334_p13 = pnand %p333_p11, %p572_p12  ;;  %s338_s0 = scalar_lea.vmem %s337_s10, 256 }
  0x3d   : > { %p339_p3 = scmp.lt.s32.totalorder %s173_s3, %s337_s10  ;;  %p340_p5 = scmp.lt.s32.totalorder %s338_s0, %s332_s8 }
  0x3e   : > { %p335_p1 = pneg %p334_p13 }
  0x3f   : > { %p341_p8 = por %p340_p5, %p339_p3 }
  0x41   : > { %p342_p10 = pnand %p341_p8, %p335_p1 }
  0xc0   : > { %v136_v1 = vpop.xlane.xlu0 %135 }
  0xc1   : > { %v138_v2 = vmul.f32 0.0078125, %v136_v1 }
  0xc3   : > { %v139_v3 = vsub.f32 %v134_v0, %v138_v2 }
  0xc5   : > { %v140_v4 = vmul.f32 %v139_v3, %v139_v3 }
  0xc7   : > { %141 = vadd.xlane.f32.xlu0 %v140_v4 }
 0x150   : > { %v142_v5 = vpop.xlane.xlu0 %141 }
 0x151   : > { %v143_v6 = vmul.f32 0.007874016, %v142_v5 }
 0x153   : > { %300 = vrsqrt.f32 %v143_v6  ;;  %vm146_vm0 = vcmp.eq.f32.partialorder %v143_v6, inf  ;;  %v149_v9 = vand.u32 2147483648, %v143_v6  ;;  %vm148_vm1 = vcmp.eq.f32.partialorder %v143_v6, 0.0 }
 0x160   : > { %v301_v7 = vpop.eup %300 }
 0x161   : > { %v145_v8 = vmul.f32 %v301_v7, %v143_v6 }
 0x163   : > { %v147_v10 = vsel %vm146_vm0, %v143_v6, %v145_v8 }
 0x164   : > { %v150_v11 = vsel %vm148_vm1, %v149_v9, %v147_v10 }
 0x165   : > { %v151_v12 = vadd.f32 1e-05, %v150_v11 }
 0x167   : > { %302 = vrcp.f32 %v151_v12 }
 0x174   : > { %v303_v14 = vpop.eup %302 }
 0x175   : > { %v155_v15 = vmul.f32 %v303_v14, %v154_v13 }
 0x177   : > { %v156_v16 = vmul.f32 %v155_v15, %v139_v3 }
 0x179   : > { %157 = vst [vmem:[%s133_s30] sm:$0xff] %v156_v16 }
 0x17a   : > { %345 = shalt.err (!%p342_p10)
}
 0x17b   : > { %s346_s15 = scalar_lea.hbm %s170_s6, 128  ;;  %s350_s20 = scalar_lea.hbm %s561_s2, 256 }
 0x17c   : > { %p347_p2 = scmp.ne.s32.totalorder %s170_s6, %s346_s15  ;;  %p351_p7 = scmp.lt.s32.totalorder %s170_s6, %s561_s2 }
 0x17d   : > { %p352_p0 = scmp.lt.s32.totalorder %s350_s20, %s346_s15 }
 0x17e   : > { %p348_p4 = pnand %p347_p2, %p572_p12 }
 0x17f   : > { %p353_p6 = por %p352_p0, %p351_p7 }
 0x180   : > { %p349_p9 = pneg %p348_p4 }
 0x182   : > { %p354_p11 = pnand %p353_p6, %p349_p9 }
 0x184   : > { %357 = shalt.err (!%p354_p11)
}
 0x185   : > { %256 = dma.vmem_to_hbm [thread:$0]  (%p572_p12), %s173_s3, 128, %s170_s6, %s159_s7  }
 0x186 PF: > { %s184_s26 = sand.u32 1, %s384_s11   ;;  %p573_p13 = scmp.ne.s32.totalorder %s567_s23, 0 }
 0x187   : > { %p574_p1 = scmp.ge.s32.totalorder %s396_s14, 2  ;;  %s185_s27 = scalar_lea.sflag [#allocation6], %s184_s26 }
 0x189   : > { %p263_p3 = pnand %p574_p1, %p573_p13 }
 0x18b   : > { %p264_p5 = pneg %p263_p3 }
 0x18d   : > { %379 = dma.done.wait (%p264_p5), %s185_s27, 128  }
 0x18e   : > { %381 = vsyncadd (%p264_p5), %s185_s27, 4294967168  ;;  %p16_p8 = scmp.ge.s32.totalorder %s443_s16, 4   ;;  %s575_s11 = smov %s388_s12 }
 0x18f   : > { %s576_s12 = smov %s392_s13  ;;  %s577_s13 = smov %s455_s19 }
 0x190   : > { %s578_s14 = smov %s443_s16  ;;  %18 = sbr.rel (!%p16_p8) target bundleno = 7 (0x7), region = 69 }
 0x195   :  { %190 = vsyncpa [#allocation5], 1 }
 0x196   :  { %192 = vsyncpa [#allocation5 + $0x1], 1 }
 0x197   :  { %193 = vsyncpa [#allocation6], 1 }
 0x198   :  { %195 = vsyncpa [#allocation6 + $0x1], 1 }

</bundles_post_ra>
